<compile_context>
chip_gen: v6e
topology: v6e:2x2x1
jax: 0.10.0
libtpu: 0.0.40
codegen_flags: <defaults>
</compile_context>

<pallas_src>
import functools

import numpy as np

import jax
import jax.numpy as jnp
from jax.experimental import pallas as pl
from jax.experimental.pallas import tpu as pltpu


C1 = 128   # conv1 output channels (fixed by the module)
C2 = 512   # conv2 output channels (fixed by the module)


def _round_up(x, m):
    return (x + m - 1) // m * m


# ---------------------------------------------------------------------------
# Fused Pallas kernel: the entire forward pass as three back-to-back MXU dots.
# All operands are whole-array VMEM residents (total < 1 MiB), so there is no
# grid, no accumulator scratch and no pipelining needed.
# ---------------------------------------------------------------------------
def _fused_discriminator_kernel(x1_ref, w1_ref, b1_ref, w2_ref, b2_ref,
                                w3_ref, b3_ref, o_ref, *, n_batch):
    # conv1 (3x3, 'same') at the 4 surviving output positions, bias+ReLU fused.
    #   x1: (4*n, K1p) f32, w1: (K1p, 128) f32  ->  y1: (4*n, 128) f32
    y1 = jnp.dot(x1_ref[...], w1_ref[...], preferred_element_type=jnp.float32)
    y1 = jnp.maximum(y1 + b1_ref[...], 0.0)

    # conv2 (3x3, 'same') evaluated only at output pixel (0,0).  Of its 9 kernel
    # taps only 4 touch non-padded data; each tap pairs a contiguous (n, 128)
    # row-block of y1 (position-major ordering) with a (128, 512) row-block of
    # the pre-packed bf16 weights.  bf16 MXU operands, f32 accumulation.
    acc = jnp.zeros((n_batch, C2), jnp.float32)
    for p in range(4):
        a = y1[p * n_batch:(p + 1) * n_batch, :].astype(jnp.bfloat16)
        acc = acc + jnp.dot(a, w2_ref[p * C1:(p + 1) * C1, :],
                            preferred_element_type=jnp.float32)
    y2 = jnp.maximum(acc + b2_ref[...], 0.0)                   # (n, 512) f32

    # conv3 (1x1) == per-sample linear; output channels lane-padded to 128.
    y3 = jnp.dot(y2.astype(jnp.bfloat16), w3_ref[...],
                 preferred_element_type=jnp.float32) + b3_ref[...]
    o_ref[...] = y3                                            # (n, 128) f32


def _fused_forward(x1col, packed, n_batch):
    kernel = functools.partial(_fused_discriminator_kernel, n_batch=n_batch)
    vmem_spec = pl.BlockSpec(memory_space=pltpu.MemorySpace.VMEM)
    return pl.pallas_call(
        kernel,
        out_shape=jax.ShapeDtypeStruct((n_batch, packed["w3"].shape[1]),
                                       jnp.float32),
        in_specs=[vmem_spec] * 7,
        out_specs=vmem_spec,
    )(x1col, packed["w1"], packed["b1"], packed["w2"], packed["b2"],
      packed["w3"], packed["b3"])


# ---------------------------------------------------------------------------
# Parameters (deterministic, PyTorch-default-like uniform init, torch layout)
# ---------------------------------------------------------------------------
def init_conv_params(key, cout, cin, kh, kw):
    kw_key, kb_key = jax.random.split(key)
    fan_in = cin * kh * kw
    bound = 1.0 / (fan_in ** 0.5)
    w = jax.random.uniform(kw_key, (cout, cin, kh, kw), jnp.float32,
                           minval=-bound, maxval=bound)
    b = jax.random.uniform(kb_key, (cout,), jnp.float32,
                           minval=-bound, maxval=bound)
    return w, b


def init_discriminator_params(key, input_size=3, output_size=2):
    k1, k2, k3 = jax.random.split(key, 3)
    w1, b1 = init_conv_params(k1, C1, input_size, 3, 3)
    w2, b2 = init_conv_params(k2, C2, C1, 3, 3)
    w3, b3 = init_conv_params(k3, output_size, C2, 1, 1)
    return {"w1": w1, "b1": b1, "w2": w2, "b2": b2, "w3": w3, "b3": b3}


def pack_discriminator_params(params, input_size, output_size):
    """One-time packing (hoisted out of the jitted forward): transpose to
    (K, Cout) matmul layout, prune conv2's dead kernel taps, pad, cast the big
    weights to bf16, keep biases in f32."""
    k1 = 9 * input_size
    k1p = _round_up(k1, 8)                                   # f32 sublane multiple
    w1 = jnp.transpose(params["w1"], (2, 3, 1, 0)).reshape(k1, C1)
    w1 = jnp.pad(w1, ((0, k1p - k1), (0, 0))).astype(jnp.float32)
    b1 = params["b1"].reshape(1, C1).astype(jnp.float32)

    # conv2 at output pixel (0,0): only kernel taps (kh, kw) in {1,2}x{1,2} hit
    # non-padded data.  Keep just those, stacked position-major (matches the
    # row ordering of the conv1 im2col / y1 in the kernel).
    w2 = jnp.transpose(params["w2"], (2, 3, 1, 0))[1:3, 1:3]  # (2,2,128,512)
    w2 = w2.reshape(4 * C1, C2).astype(jnp.bfloat16)
    b2 = params["b2"].reshape(1, C2).astype(jnp.float32)

    nop = _round_up(output_size, 128)                        # lane-dense output
    w3 = jnp.transpose(params["w3"], (2, 3, 1, 0)).reshape(C2, output_size)
    w3 = jnp.pad(w3, ((0, 0), (0, nop - output_size))).astype(jnp.bfloat16)
    b3 = jnp.pad(params["b3"], (0, nop - output_size)).reshape(1, nop)
    b3 = b3.astype(jnp.float32)
    return {"w1": w1, "b1": b1, "w2": w2, "b2": b2, "w3": w3, "b3": b3}


# ---------------------------------------------------------------------------
# Forward pass (NCHW in / NCHW out, like the PyTorch module)
# ---------------------------------------------------------------------------
@functools.partial(jax.jit, static_argnames=("output_size",))
def basic_discriminator_1(x_nchw, packed, *, output_size):
    N, Cin, H, W = x_nchw.shape
    oh1, ow1 = int(H * 0.5), int(W * 0.5)       # F.interpolate(scale=0.5)
    oh2, ow2 = int(oh1 * 0.5), int(ow1 * 0.5)   # second downsample
    # TODO(synk): spatial inputs smaller than 8x8 would need extra zero-pad
    # handling in this dead-compute-eliminated path (dense fallback omitted).
    assert oh2 >= 2 and ow2 >= 2, "optimized path requires H, W >= 8"

    # Only conv2's output pixel (0,0) survives interpolate(size=(1,1)); it reads
    # the 2x2 top-left corner of the second downsample, i.e. conv1 outputs at
    # rows {0, r1} x cols {0, c1}:
    r1, c1 = oh1 // oh2, ow1 // ow2             # nearest index: floor(1*in/out)
    # ...which only read rows 0..r1+1 / cols 0..c1+1 of the FIRST downsample,
    # i.e. these source pixels of x (static nearest-neighbor indices):
    hsrc = np.floor(np.arange(oh1) * (H / oh1)).astype(np.int32)[: r1 + 2]
    wsrc = np.floor(np.arange(ow1) * (W / ow1)).astype(np.int32)[: c1 + 2]

    d1 = jnp.transpose(x_nchw, (0, 2, 3, 1))[:, hsrc][:, :, wsrc]  # (N,r1+2,c1+2,C)
    d1 = jnp.pad(d1, ((0, 0), (1, 0), (1, 0), (0, 0)))             # 'same' low zeros

    # im2col for conv1 at the 4 surviving output positions, position-major row
    # ordering (row = pos * N + n), feature order (kh, kw, cin).
    rows = []
    for r in (0, r1):
        for c in (0, c1):
            rows.append(d1[:, r:r + 3, c:c + 3, :].reshape(N, 9 * Cin))
    x1col = jnp.concatenate(rows, axis=0)                          # (4N, 9*Cin)
    k1p = packed["w1"].shape[0]
    x1col = jnp.pad(x1col, ((0, 0), (0, k1p - 9 * Cin)))

    out = _fused_forward(x1col, packed, N)                         # (N, 128-padded)
    return out[:, :output_size].reshape(N, output_size, 1, 1)


# ---------------------------------------------------------------------------
# Pure-JAX f32 reference (full dense path, no dead-compute elimination)
# ---------------------------------------------------------------------------
def _nearest_downsample_half(x_nhwc):
    N, H, W, C = x_nhwc.shape
    oh, ow = int(H * 0.5), int(W * 0.5)
    hi = np.floor(np.arange(oh) * (H / oh)).astype(np.int32)
    wi = np.floor(np.arange(ow) * (W / ow)).astype(np.int32)
    return x_nhwc[:, hi][:, :, wi]


def _ref_conv(x_nhwc, weight, bias, activation):
    N, H, W, Cin = x_nhwc.shape
    Cout, _, KH, KW = weight.shape
    ph_lo = (KH - 1) // 2
    ph_hi = (KH - 1) - ph_lo
    pw_lo = (KW - 1) // 2
    pw_hi = (KW - 1) - pw_lo
    xp = jnp.pad(x_nhwc, ((0, 0), (ph_lo, ph_hi), (pw_lo, pw_hi), (0, 0)))
    cols = [xp[:, i:i + H, j:j + W, :] for i in range(KH) for j in range(KW)]
    xcol = jnp.concatenate(cols, axis=-1).reshape(N * H * W, KH * KW * Cin)
    wmat = jnp.transpose(weight, (2, 3, 1, 0)).reshape(KH * KW * Cin, Cout)
    y = xcol @ wmat + bias
    if activation == "relu":
        y = jnp.maximum(y, 0.0)
    return y.reshape(N, H, W, Cout)


def _reference_forward(x_nchw, params):
    x = jnp.transpose(x_nchw, (0, 2, 3, 1))
    x = _nearest_downsample_half(x)
    x = _ref_conv(x, params["w1"], params["b1"], "relu")
    x = _nearest_downsample_half(x)
    x = _ref_conv(x, params["w2"], params["b2"], "relu")
    x = x[:, :1, :1, :]                       # interpolate(size=(1,1), nearest)
    x = _ref_conv(x, params["w3"], params["b3"], None)
    return jnp.transpose(x, (0, 3, 1, 2))


if __name__ == "__main__":
    key = jax.random.PRNGKey(0)
    kx, kp = jax.random.split(key)

    # Small shapes consistent with the module defaults: batch=2, 3 channels, 16x16.
    x = jax.random.normal(kx, (2, 3, 16, 16), jnp.float32)
    params = init_discriminator_params(kp, input_size=3, output_size=2)
    packed = pack_discriminator_params(params, input_size=3, output_size=2)

    y = basic_discriminator_1(x, packed, output_size=2)
    y = jax.block_until_ready(y)

    assert y.shape == (2, 2, 1, 1), y.shape
    assert bool(jnp.all(jnp.isfinite(y)))

    # Numerical check against the full dense pure-JAX f32 reference (bf16 MXU
    # operands for conv2/conv3 -> modest tolerance).
    y_ref = _reference_forward(x, params)
    assert bool(jnp.allclose(y, y_ref, rtol=5e-2, atol=5e-2)), float(
        jnp.max(jnp.abs(y - y_ref))
    )

    print("KERNEL_OK")
</pallas_src>

<mosaic_0001>
module attributes {stable_mosaic.version = 11 : i64} {
  func.func @_fused_discriminator_kernel(%arg0: memref<8x32xf32, #tpu.memory_space<vmem>>, %arg1: memref<32x128xf32, #tpu.memory_space<vmem>>, %arg2: memref<1x128xf32, #tpu.memory_space<vmem>>, %arg3: memref<512x512xbf16, #tpu.memory_space<vmem>>, %arg4: memref<1x512xf32, #tpu.memory_space<vmem>>, %arg5: memref<512x128xbf16, #tpu.memory_space<vmem>>, %arg6: memref<1x128xf32, #tpu.memory_space<vmem>>, %arg7: memref<2x128xf32, #tpu.memory_space<vmem>>) attributes {dimension_semantics = [], scalar_prefetch = 0 : i64, scratch_operands = 0 : i64, tpu.core_type = #tpu.core_type<tc>} {
    %c0 = arith.constant 0 : index
    %c0_0 = arith.constant 0 : index
    %0 = vector.load %arg0[%c0, %c0_0] : memref<8x32xf32, #tpu.memory_space<vmem>>, vector<8x32xf32>
    %c0_1 = arith.constant 0 : index
    %c0_2 = arith.constant 0 : index
    %1 = vector.load %arg1[%c0_1, %c0_2] : memref<32x128xf32, #tpu.memory_space<vmem>>, vector<32x128xf32>
    %cst = arith.constant dense<0.000000e+00> : vector<8x128xf32>
    %2 = tpu.matmul %0, %1, %cst {dimension_numbers = #tpu.dot_dimension_numbers<[1], [0], [0], [1], [0, 0, 1, 1], [], []>} : vector<8x32xf32>, vector<32x128xf32>, vector<8x128xf32> -> vector<8x128xf32>
    %c0_3 = arith.constant 0 : index
    %c0_4 = arith.constant 0 : index
    %3 = vector.load %arg2[%c0_3, %c0_4] : memref<1x128xf32, #tpu.memory_space<vmem>>, vector<1x128xf32>
    %4 = vector.broadcast %3 : vector<1x128xf32> to vector<8x128xf32>
    %5 = arith.addf %2, %4 : vector<8x128xf32>
    %cst_5 = arith.constant 0.000000e+00 : f32
    %6 = vector.broadcast %cst_5 : f32 to vector<8x128xf32>
    %7 = arith.maximumf %5, %6 : vector<8x128xf32>
    %cst_6 = arith.constant 0.000000e+00 : f32
    %8 = vector.broadcast %cst_6 : f32 to vector<2x512xf32>
    %9 = vector.extract_strided_slice %7 {offsets = [0, 0], sizes = [2, 128], strides = [1, 1]} : vector<8x128xf32> to vector<2x128xf32>
    %10 = arith.truncf %9 : vector<2x128xf32> to vector<2x128xbf16>
    %c0_7 = arith.constant 0 : index
    %c0_8 = arith.constant 0 : index
    %11 = vector.load %arg3[%c0_7, %c0_8] : memref<512x512xbf16, #tpu.memory_space<vmem>>, vector<128x512xbf16>
    %cst_9 = arith.constant dense<0.000000e+00> : vector<2x512xf32>
    %12 = tpu.matmul %10, %11, %cst_9 {dimension_numbers = #tpu.dot_dimension_numbers<[1], [0], [0], [1], [0, 0, 1, 1], [], []>} : vector<2x128xbf16>, vector<128x512xbf16>, vector<2x512xf32> -> vector<2x512xf32>
    %13 = arith.addf %8, %12 : vector<2x512xf32>
    %14 = vector.extract_strided_slice %7 {offsets = [2, 0], sizes = [2, 128], strides = [1, 1]} : vector<8x128xf32> to vector<2x128xf32>
    %15 = arith.truncf %14 : vector<2x128xf32> to vector<2x128xbf16>
    %c128 = arith.constant 128 : index
    %c0_10 = arith.constant 0 : index
    %16 = vector.load %arg3[%c128, %c0_10] : memref<512x512xbf16, #tpu.memory_space<vmem>>, vector<128x512xbf16>
    %cst_11 = arith.constant dense<0.000000e+00> : vector<2x512xf32>
    %17 = tpu.matmul %15, %16, %cst_11 {dimension_numbers = #tpu.dot_dimension_numbers<[1], [0], [0], [1], [0, 0, 1, 1], [], []>} : vector<2x128xbf16>, vector<128x512xbf16>, vector<2x512xf32> -> vector<2x512xf32>
    %18 = arith.addf %13, %17 : vector<2x512xf32>
    %19 = vector.extract_strided_slice %7 {offsets = [4, 0], sizes = [2, 128], strides = [1, 1]} : vector<8x128xf32> to vector<2x128xf32>
    %20 = arith.truncf %19 : vector<2x128xf32> to vector<2x128xbf16>
    %c256 = arith.constant 256 : index
    %c0_12 = arith.constant 0 : index
    %21 = vector.load %arg3[%c256, %c0_12] : memref<512x512xbf16, #tpu.memory_space<vmem>>, vector<128x512xbf16>
    %cst_13 = arith.constant dense<0.000000e+00> : vector<2x512xf32>
    %22 = tpu.matmul %20, %21, %cst_13 {dimension_numbers = #tpu.dot_dimension_numbers<[1], [0], [0], [1], [0, 0, 1, 1], [], []>} : vector<2x128xbf16>, vector<128x512xbf16>, vector<2x512xf32> -> vector<2x512xf32>
    %23 = arith.addf %18, %22 : vector<2x512xf32>
    %24 = vector.extract_strided_slice %7 {offsets = [6, 0], sizes = [2, 128], strides = [1, 1]} : vector<8x128xf32> to vector<2x128xf32>
    %25 = arith.truncf %24 : vector<2x128xf32> to vector<2x128xbf16>
    %c384 = arith.constant 384 : index
    %c0_14 = arith.constant 0 : index
    %26 = vector.load %arg3[%c384, %c0_14] : memref<512x512xbf16, #tpu.memory_space<vmem>>, vector<128x512xbf16>
    %cst_15 = arith.constant dense<0.000000e+00> : vector<2x512xf32>
    %27 = tpu.matmul %25, %26, %cst_15 {dimension_numbers = #tpu.dot_dimension_numbers<[1], [0], [0], [1], [0, 0, 1, 1], [], []>} : vector<2x128xbf16>, vector<128x512xbf16>, vector<2x512xf32> -> vector<2x512xf32>
    %28 = arith.addf %23, %27 : vector<2x512xf32>
    %c0_16 = arith.constant 0 : index
    %c0_17 = arith.constant 0 : index
    %29 = vector.load %arg4[%c0_16, %c0_17] : memref<1x512xf32, #tpu.memory_space<vmem>>, vector<1x512xf32>
    %30 = vector.broadcast %29 : vector<1x512xf32> to vector<2x512xf32>
    %31 = arith.addf %28, %30 : vector<2x512xf32>
    %cst_18 = arith.constant 0.000000e+00 : f32
    %32 = vector.broadcast %cst_18 : f32 to vector<2x512xf32>
    %33 = arith.maximumf %31, %32 : vector<2x512xf32>
    %34 = arith.truncf %33 : vector<2x512xf32> to vector<2x512xbf16>
    %c0_19 = arith.constant 0 : index
    %c0_20 = arith.constant 0 : index
    %35 = vector.load %arg5[%c0_19, %c0_20] : memref<512x128xbf16, #tpu.memory_space<vmem>>, vector<512x128xbf16>
    %cst_21 = arith.constant dense<0.000000e+00> : vector<2x128xf32>
    %36 = tpu.matmul %34, %35, %cst_21 {dimension_numbers = #tpu.dot_dimension_numbers<[1], [0], [0], [1], [0, 0, 1, 1], [], []>} : vector<2x512xbf16>, vector<512x128xbf16>, vector<2x128xf32> -> vector<2x128xf32>
    %c0_22 = arith.constant 0 : index
    %c0_23 = arith.constant 0 : index
    %37 = vector.load %arg6[%c0_22, %c0_23] : memref<1x128xf32, #tpu.memory_space<vmem>>, vector<1x128xf32>
    %38 = vector.broadcast %37 : vector<1x128xf32> to vector<2x128xf32>
    %39 = arith.addf %36, %38 : vector<2x128xf32>
    %c0_24 = arith.constant 0 : index
    %c0_25 = arith.constant 0 : index
    %40 = vector.load %arg7[%c0_24, %c0_25] : memref<2x128xf32, #tpu.memory_space<vmem>>, vector<2x128xf32>
    tpu.vector_store %arg7[%c0_24, %c0_25], %39 {strides = array<i32>} : memref<2x128xf32, #tpu.memory_space<vmem>>, vector<2x128xf32>,
    return
  }
}

</mosaic_0001>

<bundles_post_ra>
// kernel: basic_discriminator_1.1
= control target key start
LH: loop header
LB: loop body
LE: loop exit
PB: predicated region body
PF: predicated region fallthrough
CT: control target
= control target key end

     0   :  { %12 = vsyncpa [#allocation3], 0  ;;  %s2608_s0 = inlined_call_operand.vmem [shape: f32[8,32], index: 0, kind: input, shape index: {}]   ;;  %s2609_s1 = inlined_call_operand.vmem [shape: f32[32,128], index: 1, kind: input, shape index: {}]   ;;  %s2610_s2 = inlined_call_operand.vmem [shape: f32[1,128], index: 2, kind: input, shape index: {}]   ;;  %s2611_s3 = inlined_call_operand.vmem [shape: bf16[512,512], index: 3, kind: input, shape index: {}]   ;;  %s2612_s4 = inlined_call_operand.vmem [shape: f32[1,512], index: 4, kind: input, shape index: {}]   ;;  %s2613_s5 = inlined_call_operand.hbm [shape: bf16[512,128], index: 5, kind: input, shape index: {}]   ;;  %s2614_s6 = inlined_call_operand.vmem [shape: f32[1,128], index: 6, kind: input, shape index: {}]   ;;  %s2615_s7 = inlined_call_operand.hbm [shape: f32[2,128], index: 7, kind: output, shape index: {}]  }
   0x1   :  { %13 = vsyncpa [#allocation4], 0  ;;  %s2132_s24 = smov [#allocation2]  }
   0x2   :  { %s29_s25 = sshll.u32 %s2132_s24, 4  ;;  %s30_s25 = int_to_ptr.vmem [resolvable:$true] %s29_s25 }
   0x3   :  { %s2096_s26 = scalar_lea.vmem %s30_s25, 4096  ;;  %p2101_p1 = scmp.lt.s32.totalorder %s30_s25, %s30_s25 }
   0x4   :  { %p2097_p0 = scmp.ne.s32.totalorder %s30_s25, %s2096_s26  ;;  %p2102_p2 = scmp.lt.s32.totalorder %s2096_s26, %s2096_s26 }
   0x6   :  { %p2103_p3 = por %p2102_p2, %p2101_p1 }
   0x8   :  { %p2104_p4 = pnand %p2103_p3, %p2097_p0 }
   0xa   :  { %2107 = shalt.err (!%p2104_p4)
}
   0xb   :  { %s2133_s27 = smov 64   ;;  %s2134_s28 = smov 4  }
   0xc   :  { %35 = dma.hbm_to_vmem [thread:$0]  %s2613_s5, 4096, %s30_s25, [#allocation3], %s2133_s27, %s2133_s27, %s2134_s28  }
   0xd   :  { %2128 = dma.done.wait [#allocation3], 4096  }
   0xe   :  { %2129 = vsyncadd [#allocation3], 4294963200  ;;  %v2135_v0 = vmov 0.0   ;;  %vm2136_vm0 = vmmov 0   ;;  %v46_v1 = vld [vmem:[%s2609_s1 + $0x18] sm:$0xff]  ;;  %v45_v2 = vld [vmem:[%s2609_s1 + $0x10] sm:$0xff] }
   0xf   :  { %1846 = vmatprep.subr.mxu0 %v2135_v0  ;;  %1854 = vmatprep.mubr.msk.f32.mxu0 %vm2136_vm0, %v2135_v0  ;;  %v44_v3 = vld [vmem:[%s2609_s1 + $0x8] sm:$0xff]  ;;  %v43_v4 = vld [vmem:[%s2609_s1] sm:$0xff]  ;;  %vm54_vm1 = vcmask 261120   ;;  %v2137_v39 = vmov 0   ;;  %s2138_s11 = smov [#allocation5]  }
  0x10   :  { %1847 = vmatpush3.msra.mxu0 %v46_v1  ;;  %v1864_v5 = vld [vmem:[%s2611_s3 + $0x1e4] ss:$16 sps:$4 sm:$0xff]   ;;  %v1866_v7 = vld [vmem:[%s2611_s3 + $0x1e8] ss:$16 sps:$4 sm:$0xff]   ;;  %v1868_v8 = vld [vmem:[%s2611_s3 + $0x1ec] ss:$16 sps:$4 sm:$0xff]   ;;  %389 = vmatprep.mubr.bf16.mxu1 %v2137_v39 }
  0x11   :  { %1848 = vmatprep.subr.mxu0 %v2135_v0  ;;  %v42_v6 = vld [vmem:[%s2608_s0] sm:$0xff]  ;;  %357 = vmatprep.subr.bf16.mxu1 %v1864_v5  ;;  %v1874_v11 = vld [vmem:[%s2611_s3 + $0x1cc] ss:$16 sps:$4 sm:$0xff]   ;;  %v1872_v14 = vld [vmem:[%s2611_s3 + $0x1c8] ss:$16 sps:$4 sm:$0xff]   ;;  %s1625_s12 = sshll.u32 %s2138_s11, 4  ;;  %s1626_s12 = int_to_ptr.vmem [resolvable:$true] %s1625_s12 }
  0x12   :  { %1849 = vmatpush3.msra.mxu0 %v45_v2  ;;  %v1869_v9 = vld [vmem:[%s2611_s3 + $0x1e0] ss:$16 sps:$4 sm:$0xff]   ;;  %v1870_v10 = vld [vmem:[%s2611_s3 + $0x1c4] ss:$16 sps:$4 sm:$0xff]   ;;  %v1880_v15 = vld [vmem:[%s2611_s3 + $0x1ac] ss:$16 sps:$4 sm:$0xff]   ;;  %p2113_p6 = scmp.lt.s32.totalorder %s1626_s12, %s1626_s12 }
  0x13   :  { %1850 = vmatprep.subr.mxu0 %v2135_v0  ;;  %358 = vmatpush1.bf16.msra.mxu1 %v1869_v9  ;;  %v1875_v12 = vld [vmem:[%s2611_s3 + $0x1c0] ss:$16 sps:$4 sm:$0xff]   ;;  %v1876_v13 = vld [vmem:[%s2611_s3 + $0x1a4] ss:$16 sps:$4 sm:$0xff]   ;;  %v1878_v18 = vld [vmem:[%s2611_s3 + $0x1a8] ss:$16 sps:$4 sm:$0xff]  }
  0x14   :  { %1851 = vmatpush3.msra.mxu0 %v44_v3  ;;  %359 = vmatprep.subr.bf16.mxu1 %v1870_v10  ;;  %v1881_v16 = vld [vmem:[%s2611_s3 + $0x1a0] ss:$16 sps:$4 sm:$0xff]   ;;  %v1882_v17 = vld [vmem:[%s2611_s3 + $0x184] ss:$16 sps:$4 sm:$0xff]   ;;  %v1886_v19 = vld [vmem:[%s2611_s3 + $0x18c] ss:$16 sps:$4 sm:$0xff]  }
  0x15   :  { %1852 = vmatprep.subr.mxu0 %v2135_v0  ;;  %v1887_v20 = vld [vmem:[%s2611_s3 + $0x180] ss:$16 sps:$4 sm:$0xff]   ;;  %v1888_v21 = vld [vmem:[%s2611_s3 + $0x164] ss:$16 sps:$4 sm:$0xff]   ;;  %v1884_v22 = vld [vmem:[%s2611_s3 + $0x188] ss:$16 sps:$4 sm:$0xff]  }
  0x16   :  { %1853 = vmatpush3.msra.mxu0 %v43_v4  ;;  %v1892_v23 = vld [vmem:[%s2611_s3 + $0x16c] ss:$16 sps:$4 sm:$0xff]   ;;  %v1893_v24 = vld [vmem:[%s2611_s3 + $0x160] ss:$16 sps:$4 sm:$0xff]   ;;  %v1894_v25 = vld [vmem:[%s2611_s3 + $0x144] ss:$16 sps:$4 sm:$0xff]  }
  0x17   :  { %1855 = vmatmul.mubr.msk.f32.vlgmr.msra.gmra.mxu0 %vm54_vm1, %v42_v6  ;;  %398 = vmatprep.subr.bf16.mxu0 %v1868_v8  ;;  %v1890_v26 = vld [vmem:[%s2611_s3 + $0x168] ss:$16 sps:$4 sm:$0xff]   ;;  %v1898_v27 = vld [vmem:[%s2611_s3 + $0x14c] ss:$16 sps:$4 sm:$0xff]   ;;  %v1899_v28 = vld [vmem:[%s2611_s3 + $0x140] ss:$16 sps:$4 sm:$0xff]  }
  0x18   :  { %399 = vmatpush1.bf16.msra.mxu0 %v1866_v7  ;;  %360 = vmatpush1.bf16.msra.mxu1 %v1875_v12  ;;  %v1896_v29 = vld [vmem:[%s2611_s3 + $0x148] ss:$16 sps:$4 sm:$0xff]   ;;  %v1900_v30 = vld [vmem:[%s2611_s3 + $0x124] ss:$16 sps:$4 sm:$0xff]   ;;  %v1904_v31 = vld [vmem:[%s2611_s3 + $0x12c] ss:$16 sps:$4 sm:$0xff]  }
  0x19   :  { %400 = vmatprep.subr.bf16.mxu0 %v1874_v11  ;;  %361 = vmatprep.subr.bf16.mxu1 %v1876_v13  ;;  %v1902_v32 = vld [vmem:[%s2611_s3 + $0x128] ss:$16 sps:$4 sm:$0xff]   ;;  %v1905_v33 = vld [vmem:[%s2611_s3 + $0x120] ss:$16 sps:$4 sm:$0xff]   ;;  %v1906_v34 = vld [vmem:[%s2611_s3 + $0x104] ss:$16 sps:$4 sm:$0xff]  }
  0x1a   :  { %v1910_v35 = vld [vmem:[%s2611_s3 + $0x10c] ss:$16 sps:$4 sm:$0xff]   ;;  %v1908_v36 = vld [vmem:[%s2611_s3 + $0x108] ss:$16 sps:$4 sm:$0xff]   ;;  %v1911_v37 = vld [vmem:[%s2611_s3 + $0x100] ss:$16 sps:$4 sm:$0xff]   ;;  %430 = vmatprep.mubr.bf16.mxu0 %v2137_v39 }
  0x1b   :  { %v1914_v38 = vld [vmem:[%s2611_s3 + $0xe4] ss:$16 sps:$4 sm:$0xff]   ;;  %v1917_v40 = vld [vmem:[%s2611_s3 + $0xec] ss:$16 sps:$4 sm:$0xff]   ;;  %v1634_v41 = vld [vmem:[%s2610_s2] ss:$0 sm:$0xff] }
  0x1c   :  { %401 = vmatpush1.bf16.msra.mxu0 %v1872_v14  ;;  %362 = vmatpush1.bf16.msra.mxu1 %v1881_v16  ;;  %v1912_v47 = vld [vmem:[%s2611_s3 + $0xe0] ss:$16 sps:$4 sm:$0xff]   ;;  %v1915_v48 = vld [vmem:[%s2611_s3 + $0xe8] ss:$16 sps:$4 sm:$0xff]   ;;  %v1920_v50 = vld [vmem:[%s2611_s3 + $0xc4] ss:$16 sps:$4 sm:$0xff]  }
  0x1d   :  { %402 = vmatprep.subr.bf16.mxu0 %v1880_v15  ;;  %363 = vmatprep.subr.bf16.mxu1 %v1882_v17  ;;  %v1923_v51 = vld [vmem:[%s2611_s3 + $0xcc] ss:$16 sps:$4 sm:$0xff]   ;;  %v1918_v52 = vld [vmem:[%s2611_s3 + $0xc0] ss:$16 sps:$4 sm:$0xff]   ;;  %v1921_v53 = vld [vmem:[%s2611_s3 + $0xc8] ss:$16 sps:$4 sm:$0xff]  }
  0x1e   :  { %v1926_v54 = vld [vmem:[%s2611_s3 + $0xa4] ss:$16 sps:$4 sm:$0xff]   ;;  %v1929_v55 = vld [vmem:[%s2611_s3 + $0xac] ss:$16 sps:$4 sm:$0xff]   ;;  %v1924_v56 = vld [vmem:[%s2611_s3 + $0xa0] ss:$16 sps:$4 sm:$0xff]  }
  0x1f   :  { %v1927_v57 = vld [vmem:[%s2611_s3 + $0xa8] ss:$16 sps:$4 sm:$0xff]   ;;  %v1932_v58 = vld [vmem:[%s2611_s3 + $0x84] ss:$16 sps:$4 sm:$0xff]   ;;  %v1935_v59 = vld [vmem:[%s2611_s3 + $0x8c] ss:$16 sps:$4 sm:$0xff]  }
  0x20   :  { %403 = vmatpush1.bf16.msra.mxu0 %v1878_v18  ;;  %364 = vmatpush1.bf16.msra.mxu1 %v1887_v20  ;;  %v1930_v60 = vld [vmem:[%s2611_s3 + $0x80] ss:$16 sps:$4 sm:$0xff]   ;;  %v1933_v61 = vld [vmem:[%s2611_s3 + $0x88] ss:$16 sps:$4 sm:$0xff]   ;;  %v1938_v62 = vld [vmem:[%s2611_s3 + $0x64] ss:$16 sps:$4 sm:$0xff]  }
  0x21   :  { %404 = vmatprep.subr.bf16.mxu0 %v1886_v19  ;;  %365 = vmatprep.subr.bf16.mxu1 %v1888_v21  ;;  %v1941_v63 = vld [vmem:[%s2611_s3 + $0x6c] ss:$16 sps:$4 sm:$0xff]   ;;  %v1936_v0 = vld [vmem:[%s2611_s3 + $0x60] ss:$16 sps:$4 sm:$0xff]   ;;  %v1939_v1 = vld [vmem:[%s2611_s3 + $0x68] ss:$16 sps:$4 sm:$0xff]  }
  0x22   :  { %v1944_v2 = vld [vmem:[%s2611_s3 + $0x44] ss:$16 sps:$4 sm:$0xff]   ;;  %v1947_v3 = vld [vmem:[%s2611_s3 + $0x4c] ss:$16 sps:$4 sm:$0xff]   ;;  %v1942_v4 = vld [vmem:[%s2611_s3 + $0x40] ss:$16 sps:$4 sm:$0xff]  }
  0x23   :  { %v1945_v5 = vld [vmem:[%s2611_s3 + $0x48] ss:$16 sps:$4 sm:$0xff]   ;;  %v1950_v6 = vld [vmem:[%s2611_s3 + $0x24] ss:$16 sps:$4 sm:$0xff]   ;;  %v1953_v7 = vld [vmem:[%s2611_s3 + $0x2c] ss:$16 sps:$4 sm:$0xff]  }
  0x24   :  { %405 = vmatpush1.bf16.msra.mxu0 %v1884_v22  ;;  %366 = vmatpush1.bf16.msra.mxu1 %v1893_v24  ;;  %v1948_v8 = vld [vmem:[%s2611_s3 + $0x20] ss:$16 sps:$4 sm:$0xff]   ;;  %v1951_v9 = vld [vmem:[%s2611_s3 + $0x28] ss:$16 sps:$4 sm:$0xff]   ;;  %v1956_v10 = vld [vmem:[%s2611_s3 + $0x4] ss:$16 sps:$4 sm:$0xff]  }
  0x25   :  { %406 = vmatprep.subr.bf16.mxu0 %v1892_v23  ;;  %367 = vmatprep.subr.bf16.mxu1 %v1894_v25  ;;  %v1959_v11 = vld [vmem:[%s2611_s3 + $0xc] ss:$16 sps:$4 sm:$0xff]   ;;  %v1954_v12 = vld [vmem:[%s2611_s3] ss:$16 sps:$4 sm:$0xff]   ;;  %v1957_v13 = vld [vmem:[%s2611_s3 + $0x8] ss:$16 sps:$4 sm:$0xff]  }
  0x26   :  { %v1962_v14 = vld [vmem:[%s2611_s3 + $0x2e4] ss:$16 sps:$4 sm:$0xff]   ;;  %v1965_v15 = vld [vmem:[%s2611_s3 + $0x2ec] ss:$16 sps:$4 sm:$0xff]   ;;  %v1960_v16 = vld [vmem:[%s2611_s3 + $0x2e0] ss:$16 sps:$4 sm:$0xff]  }
  0x27   :  { %v1963_v17 = vld [vmem:[%s2611_s3 + $0x2e8] ss:$16 sps:$4 sm:$0xff]   ;;  %v1968_v18 = vld [vmem:[%s2611_s3 + $0x2c4] ss:$16 sps:$4 sm:$0xff]   ;;  %v1971_v19 = vld [vmem:[%s2611_s3 + $0x2cc] ss:$16 sps:$4 sm:$0xff]  }
  0x28   :  { %407 = vmatpush1.bf16.msra.mxu0 %v1890_v26  ;;  %368 = vmatpush1.bf16.msra.mxu1 %v1899_v28  ;;  %v1966_v20 = vld [vmem:[%s2611_s3 + $0x2c0] ss:$16 sps:$4 sm:$0xff]   ;;  %v1969_v21 = vld [vmem:[%s2611_s3 + $0x2c8] ss:$16 sps:$4 sm:$0xff]   ;;  %v1974_v22 = vld [vmem:[%s2611_s3 + $0x2a4] ss:$16 sps:$4 sm:$0xff]  }
  0x29   :  { %408 = vmatprep.subr.bf16.mxu0 %v1898_v27  ;;  %369 = vmatprep.subr.bf16.mxu1 %v1900_v30  ;;  %v1977_v23 = vld [vmem:[%s2611_s3 + $0x2ac] ss:$16 sps:$4 sm:$0xff]   ;;  %v1972_v24 = vld [vmem:[%s2611_s3 + $0x2a0] ss:$16 sps:$4 sm:$0xff]   ;;  %v1975_v25 = vld [vmem:[%s2611_s3 + $0x2a8] ss:$16 sps:$4 sm:$0xff]  }
  0x2a   :  { %v1980_v26 = vld [vmem:[%s2611_s3 + $0x284] ss:$16 sps:$4 sm:$0xff]   ;;  %v1983_v27 = vld [vmem:[%s2611_s3 + $0x28c] ss:$16 sps:$4 sm:$0xff]   ;;  %v1978_v28 = vld [vmem:[%s2611_s3 + $0x280] ss:$16 sps:$4 sm:$0xff]  }
  0x2b   :  { %v1986_v30 = vld [vmem:[%s2611_s3 + $0x264] ss:$16 sps:$4 sm:$0xff]   ;;  %s2108_s13 = scalar_lea.vmem %s1626_s12, 32 }
  0x2c   :  { %409 = vmatpush1.bf16.msra.mxu0 %v1896_v29  ;;  %370 = vmatpush1.bf16.msra.mxu1 %v1905_v33  ;;  %v1981_v29 = vld [vmem:[%s2611_s3 + $0x288] ss:$16 sps:$4 sm:$0xff]   ;;  %p2109_p5 = scmp.ne.s32.totalorder %s1626_s12, %s2108_s13  ;;  %p2114_p7 = scmp.lt.s32.totalorder %s2108_s13, %s2108_s13 }
  0x2d   :  { %410 = vmatprep.subr.bf16.mxu0 %v1904_v31  ;;  %371 = vmatprep.subr.bf16.mxu1 %v1906_v34  ;;  %v1989_v31 = vld [vmem:[%s2611_s3 + $0x26c] ss:$16 sps:$4 sm:$0xff]   ;;  %v1987_v33 = vld [vmem:[%s2611_s3 + $0x268] ss:$16 sps:$4 sm:$0xff]   ;;  %v1992_v34 = vld [vmem:[%s2611_s3 + $0x244] ss:$16 sps:$4 sm:$0xff]  }
  0x2e   :  { %p2115_p8 = por %p2114_p7, %p2113_p6 }
  0x30   :  { %411 = vmatpush1.bf16.msra.mxu0 %v1902_v32  ;;  %372 = vmatpush1.bf16.msra.mxu1 %v1911_v37  ;;  %v1984_v32 = vld [vmem:[%s2611_s3 + $0x260] ss:$16 sps:$4 sm:$0xff]   ;;  %v1993_v37 = vld [vmem:[%s2611_s3 + $0x248] ss:$16 sps:$4 sm:$0xff]   ;;  %p2116_p9 = pnand %p2115_p8, %p2109_p5 }
  0x31   :  { %412 = vmatprep.subr.bf16.mxu0 %v1910_v35  ;;  %599 = vmatprep.subr.bf16.mxu1 %v1914_v38  ;;  %v1995_v35 = vld [vmem:[%s2611_s3 + $0x24c] ss:$16 sps:$4 sm:$0xff]   ;;  %v1998_v38 = vld [vmem:[%s2611_s3 + $0x224] ss:$16 sps:$4 sm:$0xff]  }
  0x34   :  { %413 = vmatpush1.bf16.msra.mxu0 %v1908_v36  ;;  %v1990_v36 = vld [vmem:[%s2611_s3 + $0x240] ss:$16 sps:$4 sm:$0xff]  }
  0x35   :  { %640 = vmatprep.subr.bf16.mxu0 %v1917_v40  ;;  %v2001_v40 = vld [vmem:[%s2611_s3 + $0x22c] ss:$16 sps:$4 sm:$0xff]  }
  0xd7   :  { %v124_v42 = vpop.f32.mrf.mxu0 }
  0xd8   :  { %v125_v43 = vadd.f32 %v1634_v41, %v124_v42  ;;  %v1996_v41 = vld [vmem:[%s2611_s3 + $0x220] ss:$16 sps:$4 sm:$0xff]   ;;  %v1999_v42 = vld [vmem:[%s2611_s3 + $0x228] ss:$16 sps:$4 sm:$0xff]  }
  0xd9   :  { %v1856_v44 = vpop.f32.mrf.mxu0 }
  0xda   :  { %v128_v45 = vmax.f32 %v125_v43, 0.0  ;;  %v2004_v43 = vld [vmem:[%s2611_s3 + $0x204] ss:$16 sps:$4 sm:$0xff]   ;;  %v2007_v44 = vld [vmem:[%s2611_s3 + $0x20c] ss:$16 sps:$4 sm:$0xff]  }
  0xdc   :  { %v2304_v46 = vpack.c.bf16 %v128_v45, %v128_v45  ;;  %v2002_v45 = vld [vmem:[%s2611_s3 + $0x200] ss:$16 sps:$4 sm:$0xff]  }
  0xde   :  { %v195_v49 = vrot.slane %v2304_v46, 1 }
  0xe0   :  { %390 = vmatmul.mubr.bf16.vlgmr.msra.gmra.mxu1 %v195_v49  ;;  %431 = vmatmul.mubr.bf16.vlgmr.msra.gmra.mxu0 %v195_v49  ;;  %v2013_v49 = vld [vmem:[%s2611_s3 + $0x3ec] ss:$16 sps:$4 sm:$0xff]  }
  0xe1   :  { %600 = vmatpush1.bf16.msra.mxu1 %v1912_v47  ;;  %641 = vmatpush1.bf16.msra.mxu0 %v1915_v48  ;;  %v2005_v47 = vld [vmem:[%s2611_s3 + $0x208] ss:$16 sps:$4 sm:$0xff]   ;;  %v2010_v48 = vld [vmem:[%s2611_s3 + $0x3e4] ss:$16 sps:$4 sm:$0xff]  }
  0xe2   :  { %601 = vmatprep.subr.bf16.mxu1 %v1920_v50  ;;  %642 = vmatprep.subr.bf16.mxu0 %v1923_v51  ;;  %v2008_v50 = vld [vmem:[%s2611_s3 + $0x3e0] ss:$16 sps:$4 sm:$0xff]   ;;  %v2011_v51 = vld [vmem:[%s2611_s3 + $0x3e8] ss:$16 sps:$4 sm:$0xff]  }
  0xe3   :  { %631 = vmatprep.mubr.bf16.mxu1 %v2137_v39  ;;  %672 = vmatprep.mubr.bf16.mxu0 %v2137_v39 }
  0xe5   :  { %602 = vmatpush1.bf16.msra.mxu1 %v1918_v52  ;;  %643 = vmatpush1.bf16.msra.mxu0 %v1921_v53  ;;  %v713_v52 = vrot.slane %v2304_v46, 2  ;;  %v2016_v53 = vld [vmem:[%s2611_s3 + $0x3c4] ss:$16 sps:$4 sm:$0xff]  }
  0xe6   :  { %603 = vmatprep.subr.bf16.mxu1 %v1926_v54  ;;  %644 = vmatprep.subr.bf16.mxu0 %v1929_v55  ;;  %v2019_v54 = vld [vmem:[%s2611_s3 + $0x3cc] ss:$16 sps:$4 sm:$0xff]   ;;  %v2014_v55 = vld [vmem:[%s2611_s3 + $0x3c0] ss:$16 sps:$4 sm:$0xff]  }
  0xe9   :  { %604 = vmatpush1.bf16.msra.mxu1 %v1924_v56  ;;  %645 = vmatpush1.bf16.msra.mxu0 %v1927_v57  ;;  %v2017_v56 = vld [vmem:[%s2611_s3 + $0x3c8] ss:$16 sps:$4 sm:$0xff]   ;;  %v2022_v57 = vld [vmem:[%s2611_s3 + $0x3a4] ss:$16 sps:$4 sm:$0xff]  }
  0xea   :  { %605 = vmatprep.subr.bf16.mxu1 %v1932_v58  ;;  %646 = vmatprep.subr.bf16.mxu0 %v1935_v59  ;;  %v2025_v58 = vld [vmem:[%s2611_s3 + $0x3ac] ss:$16 sps:$4 sm:$0xff]   ;;  %v2020_v59 = vld [vmem:[%s2611_s3 + $0x3a0] ss:$16 sps:$4 sm:$0xff]  }
  0xed   :  { %606 = vmatpush1.bf16.msra.mxu1 %v1930_v60  ;;  %647 = vmatpush1.bf16.msra.mxu0 %v1933_v61  ;;  %v2023_v60 = vld [vmem:[%s2611_s3 + $0x3a8] ss:$16 sps:$4 sm:$0xff]   ;;  %v2028_v61 = vld [vmem:[%s2611_s3 + $0x384] ss:$16 sps:$4 sm:$0xff]  }
  0xee   :  { %607 = vmatprep.subr.bf16.mxu1 %v1938_v62  ;;  %648 = vmatprep.subr.bf16.mxu0 %v1941_v63  ;;  %v2026_v62 = vld [vmem:[%s2611_s3 + $0x380] ss:$16 sps:$4 sm:$0xff]   ;;  %v2029_v63 = vld [vmem:[%s2611_s3 + $0x388] ss:$16 sps:$4 sm:$0xff]  }
  0xf1   :  { %608 = vmatpush1.bf16.msra.mxu1 %v1936_v0  ;;  %649 = vmatpush1.bf16.msra.mxu0 %v1939_v1  ;;  %v2034_v0 = vld [vmem:[%s2611_s3 + $0x364] ss:$16 sps:$4 sm:$0xff]   ;;  %v2037_v1 = vld [vmem:[%s2611_s3 + $0x36c] ss:$16 sps:$4 sm:$0xff]  }
  0xf2   :  { %609 = vmatprep.subr.bf16.mxu1 %v1944_v2  ;;  %650 = vmatprep.subr.bf16.mxu0 %v1947_v3  ;;  %v2032_v2 = vld [vmem:[%s2611_s3 + $0x360] ss:$16 sps:$4 sm:$0xff]   ;;  %v2035_v3 = vld [vmem:[%s2611_s3 + $0x368] ss:$16 sps:$4 sm:$0xff]  }
  0xf5   :  { %610 = vmatpush1.bf16.msra.mxu1 %v1942_v4  ;;  %651 = vmatpush1.bf16.msra.mxu0 %v1945_v5  ;;  %v2040_v4 = vld [vmem:[%s2611_s3 + $0x344] ss:$16 sps:$4 sm:$0xff]   ;;  %v2043_v5 = vld [vmem:[%s2611_s3 + $0x34c] ss:$16 sps:$4 sm:$0xff]  }
  0xf6   :  { %611 = vmatprep.subr.bf16.mxu1 %v1950_v6  ;;  %652 = vmatprep.subr.bf16.mxu0 %v1953_v7  ;;  %v2038_v6 = vld [vmem:[%s2611_s3 + $0x340] ss:$16 sps:$4 sm:$0xff]   ;;  %v2041_v7 = vld [vmem:[%s2611_s3 + $0x348] ss:$16 sps:$4 sm:$0xff]  }
  0xf9   :  { %612 = vmatpush1.bf16.msra.mxu1 %v1948_v8  ;;  %653 = vmatpush1.bf16.msra.mxu0 %v1951_v9  ;;  %v2046_v8 = vld [vmem:[%s2611_s3 + $0x324] ss:$16 sps:$4 sm:$0xff]   ;;  %v2049_v9 = vld [vmem:[%s2611_s3 + $0x32c] ss:$16 sps:$4 sm:$0xff]  }
  0xfa   :  { %613 = vmatprep.subr.bf16.mxu1 %v1956_v10  ;;  %654 = vmatprep.subr.bf16.mxu0 %v1959_v11  ;;  %v2044_v10 = vld [vmem:[%s2611_s3 + $0x320] ss:$16 sps:$4 sm:$0xff]   ;;  %v2047_v11 = vld [vmem:[%s2611_s3 + $0x328] ss:$16 sps:$4 sm:$0xff]  }
  0xfd   :  { %614 = vmatpush1.bf16.msra.mxu1 %v1954_v12  ;;  %655 = vmatpush1.bf16.msra.mxu0 %v1957_v13  ;;  %v2052_v12 = vld [vmem:[%s2611_s3 + $0x304] ss:$16 sps:$4 sm:$0xff]   ;;  %v2055_v13 = vld [vmem:[%s2611_s3 + $0x30c] ss:$16 sps:$4 sm:$0xff]  }
  0xfe   :  { %875 = vmatprep.subr.bf16.mxu1 %v1962_v14  ;;  %916 = vmatprep.subr.bf16.mxu0 %v1965_v15  ;;  %v2050_v14 = vld [vmem:[%s2611_s3 + $0x300] ss:$16 sps:$4 sm:$0xff]   ;;  %v2053_v15 = vld [vmem:[%s2611_s3 + $0x308] ss:$16 sps:$4 sm:$0xff]  }
 0x100   :  { %632 = vmatmul.mubr.bf16.vlgmr.msra.gmra.mxu1 %v2304_v46  ;;  %673 = vmatmul.mubr.bf16.vlgmr.msra.gmra.mxu0 %v2304_v46 }
 0x101   :  { %876 = vmatpush1.bf16.msra.mxu1 %v1960_v16  ;;  %917 = vmatpush1.bf16.msra.mxu0 %v1963_v17  ;;  %v993_v16 = vrot.slane %v2304_v46, 3  ;;  %v2056_v17 = vld [vmem:[#allocation2 + $0x78] sm:$0xff]   ;;  %v2066_v46 = vld [vmem:[#allocation2 + $0x28] sm:$0xff]  }
 0x102   :  { %877 = vmatprep.subr.bf16.mxu1 %v1968_v18  ;;  %918 = vmatprep.subr.bf16.mxu0 %v1971_v19  ;;  %v2057_v18 = vld [vmem:[#allocation2 + $0xf8] sm:$0xff]  }
 0x103   :  { %907 = vmatprep.mubr.bf16.mxu1 %v2137_v39  ;;  %948 = vmatprep.mubr.bf16.mxu0 %v2137_v39  ;;  %v2058_v19 = vld [vmem:[#allocation2 + $0x38] sm:$0xff]  }
 0x105   :  { %878 = vmatpush1.bf16.msra.mxu1 %v1966_v20  ;;  %919 = vmatpush1.bf16.msra.mxu0 %v1969_v21  ;;  %v2059_v20 = vld [vmem:[#allocation2 + $0xb8] sm:$0xff]   ;;  %v2060_v21 = vld [vmem:[#allocation2 + $0x70] sm:$0xff]  }
 0x106   :  { %879 = vmatprep.subr.bf16.mxu1 %v1974_v22  ;;  %920 = vmatprep.subr.bf16.mxu0 %v1977_v23  ;;  %v2061_v22 = vld [vmem:[#allocation2 + $0xf0] sm:$0xff]  }
 0x107   :  { %v2062_v23 = vld [vmem:[#allocation2 + $0x30] sm:$0xff]  }
 0x109   :  { %880 = vmatpush1.bf16.msra.mxu1 %v1972_v24  ;;  %921 = vmatpush1.bf16.msra.mxu0 %v1975_v25  ;;  %v2063_v24 = vld [vmem:[#allocation2 + $0xb0] sm:$0xff]   ;;  %v2064_v25 = vld [vmem:[#allocation2 + $0x68] sm:$0xff]  }
 0x10a   :  { %881 = vmatprep.subr.bf16.mxu1 %v1980_v26  ;;  %922 = vmatprep.subr.bf16.mxu0 %v1983_v27  ;;  %v2065_v26 = vld [vmem:[#allocation2 + $0xe8] sm:$0xff]  }
 0x10b   :  { %v2067_v27 = vld [vmem:[#allocation2 + $0xa8] sm:$0xff]  }
 0x10d   :  { %882 = vmatpush1.bf16.msra.mxu1 %v1978_v28  ;;  %923 = vmatpush1.bf16.msra.mxu0 %v1981_v29  ;;  %v2068_v28 = vld [vmem:[#allocation2 + $0x60] sm:$0xff]  }
 0x10e   :  { %883 = vmatprep.subr.bf16.mxu1 %v1986_v30  ;;  %924 = vmatprep.subr.bf16.mxu0 %v1989_v31  ;;  %v2069_v29 = vld [vmem:[#allocation2 + $0xe0] sm:$0xff]  }
 0x10f   :  { %v2070_v30 = vld [vmem:[#allocation2 + $0x20] sm:$0xff]  }
 0x110   :  { %v2071_v31 = vld [vmem:[#allocation2 + $0xa0] sm:$0xff]  }
 0x111   :  { %884 = vmatpush1.bf16.msra.mxu1 %v1984_v32  ;;  %925 = vmatpush1.bf16.msra.mxu0 %v1987_v33  ;;  %v2072_v32 = vld [vmem:[#allocation2 + $0x58] sm:$0xff]  }
 0x112   :  { %885 = vmatprep.subr.bf16.mxu1 %v1992_v34  ;;  %926 = vmatprep.subr.bf16.mxu0 %v1995_v35  ;;  %v2073_v33 = vld [vmem:[#allocation2 + $0xd8] sm:$0xff]  }
 0x113   :  { %v2074_v34 = vld [vmem:[#allocation2 + $0x18] sm:$0xff]  }
 0x114   :  { %v2075_v35 = vld [vmem:[#allocation2 + $0x98] sm:$0xff]  }
 0x115   :  { %886 = vmatpush1.bf16.msra.mxu1 %v1990_v36  ;;  %927 = vmatpush1.bf16.msra.mxu0 %v1993_v37  ;;  %v2076_v36 = vld [vmem:[#allocation2 + $0x50] sm:$0xff]  }
 0x116   :  { %887 = vmatprep.subr.bf16.mxu1 %v1998_v38  ;;  %928 = vmatprep.subr.bf16.mxu0 %v2001_v40  ;;  %v2077_v37 = vld [vmem:[#allocation2 + $0xd0] sm:$0xff]  }
 0x117   :  { %v2078_v38 = vld [vmem:[#allocation2 + $0x10] sm:$0xff]  }
 0x118   :  { %v2079_v40 = vld [vmem:[#allocation2 + $0x90] sm:$0xff]  }
 0x119   :  { %888 = vmatpush1.bf16.msra.mxu1 %v1996_v41  ;;  %929 = vmatpush1.bf16.msra.mxu0 %v1999_v42  ;;  %v2080_v41 = vld [vmem:[#allocation2 + $0x48] sm:$0xff]  }
 0x11a   :  { %889 = vmatprep.subr.bf16.mxu1 %v2004_v43  ;;  %930 = vmatprep.subr.bf16.mxu0 %v2007_v44  ;;  %v2081_v42 = vld [vmem:[#allocation2 + $0xc8] sm:$0xff]  }
 0x11b   :  { %v2082_v43 = vld [vmem:[#allocation2 + $0x8] sm:$0xff]  }
 0x11c   :  { %v2083_v44 = vld [vmem:[#allocation2 + $0x88] sm:$0xff]  }
 0x11d   :  { %890 = vmatpush1.bf16.msra.mxu1 %v2002_v45  ;;  %931 = vmatpush1.bf16.msra.mxu0 %v2005_v47  ;;  %v2084_v45 = vld [vmem:[#allocation2 + $0x40] sm:$0xff]  }
 0x11e   :  { %1155 = vmatprep.subr.bf16.mxu1 %v2010_v48  ;;  %1196 = vmatprep.subr.bf16.mxu0 %v2013_v49  ;;  %v2085_v47 = vld [vmem:[#allocation2 + $0xc0] sm:$0xff]  }
 0x11f   :  { %v2086_v48 = vld [vmem:[#allocation2] sm:$0xff]  }
 0x120   :  { %908 = vmatmul.mubr.bf16.vlgmr.msra.gmra.mxu1 %v713_v52  ;;  %949 = vmatmul.mubr.bf16.vlgmr.msra.gmra.mxu0 %v713_v52  ;;  %v2087_v49 = vld [vmem:[#allocation2 + $0x80] sm:$0xff]  }
 0x121   :  { %1156 = vmatpush1.bf16.msra.mxu1 %v2008_v50  ;;  %1197 = vmatpush1.bf16.msra.mxu0 %v2011_v51 }
 0x122   :  { %1157 = vmatprep.subr.bf16.mxu1 %v2016_v53  ;;  %1198 = vmatprep.subr.bf16.mxu0 %v2019_v54 }
 0x123   :  { %1187 = vmatprep.mubr.bf16.mxu1 %v2137_v39  ;;  %1228 = vmatprep.mubr.bf16.mxu0 %v2137_v39  ;;  %v2031_v39 = vld [vmem:[%s2611_s3 + $0x38c] ss:$16 sps:$4 sm:$0xff]  }
 0x125   :  { %1158 = vmatpush1.bf16.msra.mxu1 %v2014_v55  ;;  %1199 = vmatpush1.bf16.msra.mxu0 %v2017_v56 }
 0x126   :  { %1159 = vmatprep.subr.bf16.mxu1 %v2022_v57  ;;  %1200 = vmatprep.subr.bf16.mxu0 %v2025_v58 }
 0x129   :  { %1160 = vmatpush1.bf16.msra.mxu1 %v2020_v59  ;;  %1201 = vmatpush1.bf16.msra.mxu0 %v2023_v60 }
 0x12a   :  { %1161 = vmatprep.subr.bf16.mxu1 %v2028_v61  ;;  %1202 = vmatprep.subr.bf16.mxu0 %v2031_v39 }
 0x12d   :  { %1162 = vmatpush1.bf16.msra.mxu1 %v2026_v62  ;;  %1203 = vmatpush1.bf16.msra.mxu0 %v2029_v63 }
 0x12e   :  { %1163 = vmatprep.subr.bf16.mxu1 %v2034_v0  ;;  %1204 = vmatprep.subr.bf16.mxu0 %v2037_v1 }
 0x131   :  { %1164 = vmatpush1.bf16.msra.mxu1 %v2032_v2  ;;  %1205 = vmatpush1.bf16.msra.mxu0 %v2035_v3 }
 0x132   :  { %1165 = vmatprep.subr.bf16.mxu1 %v2040_v4  ;;  %1206 = vmatprep.subr.bf16.mxu0 %v2043_v5 }
 0x135   :  { %1166 = vmatpush1.bf16.msra.mxu1 %v2038_v6  ;;  %1207 = vmatpush1.bf16.msra.mxu0 %v2041_v7 }
 0x136   :  { %1167 = vmatprep.subr.bf16.mxu1 %v2046_v8  ;;  %1208 = vmatprep.subr.bf16.mxu0 %v2049_v9  ;;  %v1243_v9 = vlaneseq }
 0x139   :  { %1168 = vmatpush1.bf16.msra.mxu1 %v2044_v10  ;;  %1209 = vmatpush1.bf16.msra.mxu0 %v2047_v11  ;;  %v1244_v10 = vshrl.u32 %v1243_v9, 7 }
 0x13a   :  { %1169 = vmatprep.subr.bf16.mxu1 %v2052_v12  ;;  %1210 = vmatprep.subr.bf16.mxu0 %v2055_v13  ;;  %v1241_v13 = vld [vmem:[%s2612_s4] sm:$0xf] }
 0x13b   :  { %v1245_v11 = vsub.s32 0, %v1244_v10  ;;  %v1253_v12 = vsub.s32 2, %v1244_v10 }
 0x13d   :  { %1170 = vmatpush1.bf16.msra.mxu1 %v2050_v14  ;;  %1211 = vmatpush1.bf16.msra.mxu0 %v2053_v15  ;;  %v1249_v14 = vsub.s32 1, %v1244_v10  ;;  %v1257_v15 = vsub.s32 3, %v1244_v10 }
 0x13e   :  { %1802 = vmatprep.subr.bf16.mxu1 %v2056_v17  ;;  %1824 = vmatprep.subr.bf16.mxu0 %v2057_v18  ;;  %v1246_v18 = vrot.slane %v1241_v13, %v1245_v11 }
 0x140   :  { %1188 = vmatmul.mubr.bf16.vlgmr.msra.gmra.mxu1 %v993_v16  ;;  %1229 = vmatmul.mubr.bf16.vlgmr.msra.gmra.mxu0 %v993_v16 }
 0x141   :  { %1803 = vmatpush3.bf16.msra.mxu1 %v2058_v19  ;;  %1825 = vmatpush3.bf16.msra.mxu0 %v2059_v20  ;;  %v1254_v19 = vrot.slane %v1241_v13, %v1253_v12 }
 0x142   :  { %1804 = vmatprep.subr.bf16.mxu1 %v2060_v21  ;;  %1826 = vmatprep.subr.bf16.mxu0 %v2061_v22 }
 0x145   :  { %1805 = vmatpush3.bf16.msra.mxu1 %v2062_v23  ;;  %1827 = vmatpush3.bf16.msra.mxu0 %v2063_v24 }
 0x146   :  { %1806 = vmatprep.subr.bf16.mxu1 %v2064_v25  ;;  %1828 = vmatprep.subr.bf16.mxu0 %v2065_v26  ;;  %v1250_v26 = vrot.slane %v1241_v13, %v1249_v14 }
 0x149   :  { %1807 = vmatpush3.bf16.msra.mxu1 %v2066_v46  ;;  %1829 = vmatpush3.bf16.msra.mxu0 %v2067_v27  ;;  %v1258_v46 = vrot.slane %v1241_v13, %v1257_v15 }
 0x14a   :  { %1808 = vmatprep.subr.bf16.mxu1 %v2068_v28  ;;  %1830 = vmatprep.subr.bf16.mxu0 %v2069_v29 }
 0x14d   :  { %1809 = vmatpush3.bf16.msra.mxu1 %v2070_v30  ;;  %1831 = vmatpush3.bf16.msra.mxu0 %v2071_v31 }
 0x14e   :  { %1810 = vmatprep.subr.bf16.mxu1 %v2072_v32  ;;  %1832 = vmatprep.subr.bf16.mxu0 %v2073_v33 }
 0x151   :  { %1811 = vmatpush3.bf16.msra.mxu1 %v2074_v34  ;;  %1833 = vmatpush3.bf16.msra.mxu0 %v2075_v35 }
 0x152   :  { %1812 = vmatprep.subr.bf16.mxu1 %v2076_v36  ;;  %1834 = vmatprep.subr.bf16.mxu0 %v2077_v37 }
 0x155   :  { %1813 = vmatpush3.bf16.msra.mxu1 %v2078_v38  ;;  %1835 = vmatpush3.bf16.msra.mxu0 %v2079_v40 }
 0x156   :  { %1814 = vmatprep.subr.bf16.mxu1 %v2080_v41  ;;  %1836 = vmatprep.subr.bf16.mxu0 %v2081_v42 }
 0x159   :  { %1815 = vmatpush3.bf16.msra.mxu1 %v2082_v43  ;;  %1837 = vmatpush3.bf16.msra.mxu0 %v2083_v44 }
 0x15a   :  { %1816 = vmatprep.subr.bf16.mxu1 %v2084_v45  ;;  %1838 = vmatprep.subr.bf16.mxu0 %v2085_v47 }
 0x15d   :  { %1817 = vmatpush3.bf16.msra.mxu1 %v2086_v48  ;;  %1839 = vmatpush3.bf16.msra.mxu0 %v2087_v49 }
 0x1a0   :  { %v391_v50 = vpop.f32.mrf.mxu1  ;;  %v432_v51 = vpop.f32.mrf.mxu0 }
 0x1a2   :  { %v393_v52 = vpop.f32.mrf.mxu1  ;;  %v434_v53 = vpop.f32.mrf.mxu0 }
 0x1a4   :  { %v395_v54 = vpop.f32.mrf.mxu1  ;;  %v436_v55 = vpop.f32.mrf.mxu0 }
 0x1a5   :  { %v1764_v55 = vld [vmem:[%s2614_s6] ss:$0 sm:$0xff] }
 0x1a6   :  { %v396_v56 = vpop.f32.mrf.mxu1  ;;  %v437_v57 = vpop.f32.mrf.mxu0 }
 0x1c0   :  { %v633_v58 = vpop.f32.mrf.mxu1  ;;  %v674_v59 = vpop.f32.mrf.mxu0 }
 0x1c1   :  { %v634_v16 = vadd.f32 %v633_v58, %v391_v50  ;;  %v675_v17 = vadd.f32 %v674_v59, %v432_v51 }
 0x1c2   :  { %v635_v60 = vpop.f32.mrf.mxu1  ;;  %v676_v61 = vpop.f32.mrf.mxu0 }
 0x1c3   :  { %v636_v20 = vadd.f32 %v635_v60, %v393_v52  ;;  %v677_v21 = vadd.f32 %v676_v61, %v434_v53 }
 0x1c4   :  { %v637_v39 = vpop.f32.mrf.mxu1  ;;  %v678_v62 = vpop.f32.mrf.mxu0 }
 0x1c6   :  { %v638_v63 = vpop.f32.mrf.mxu1  ;;  %v679_v0 = vpop.f32.mrf.mxu0 }
 0x1e0   :  { %v909_v1 = vpop.f32.mrf.mxu1  ;;  %v950_v2 = vpop.f32.mrf.mxu0 }
 0x1e1   :  { %v957_v22 = vadd.f32 %v909_v1, %v634_v16  ;;  %v959_v23 = vadd.f32 %v950_v2, %v675_v17 }
 0x1e2   :  { %v911_v3 = vpop.f32.mrf.mxu1  ;;  %v952_v4 = vpop.f32.mrf.mxu0 }
 0x1e3   :  { %v958_v27 = vadd.f32 %v911_v3, %v636_v20  ;;  %v960_v28 = vadd.f32 %v952_v4, %v677_v21 }
 0x1e4   :  { %v913_v5 = vpop.f32.mrf.mxu1  ;;  %v954_v6 = vpop.f32.mrf.mxu0 }
 0x1e6   :  { %v914_v7 = vpop.f32.mrf.mxu1  ;;  %v955_v8 = vpop.f32.mrf.mxu0 }
 0x200   :  { %v1189_v24 = vpop.f32.mrf.mxu1  ;;  %v1230_v25 = vpop.f32.mrf.mxu0 }
 0x201   :  { %v1237_v29 = vadd.f32 %v1189_v24, %v957_v22  ;;  %v1239_v30 = vadd.f32 %v1230_v25, %v959_v23 }
 0x202   :  { %v1191_v31 = vpop.f32.mrf.mxu1  ;;  %v1232_v32 = vpop.f32.mrf.mxu0 }
 0x203   :  { %v1263_v33 = vadd.f32 %v1246_v18, %v1237_v29  ;;  %v1265_v34 = vadd.f32 %v1254_v19, %v1239_v30  ;;  %v1238_v35 = vadd.f32 %v1191_v31, %v958_v27  ;;  %v1240_v36 = vadd.f32 %v1232_v32, %v960_v28 }
 0x204   :  { %v1193_v37 = vpop.f32.mrf.mxu1  ;;  %v1234_v38 = vpop.f32.mrf.mxu0 }
 0x205   :  { %v1264_v40 = vadd.f32 %v1250_v26, %v1238_v35  ;;  %v1266_v41 = vadd.f32 %v1258_v46, %v1240_v36  ;;  %v1267_v42 = vmax.f32 %v1263_v33, 0.0  ;;  %v1269_v43 = vmax.f32 %v1265_v34, 0.0 }
 0x206   :  { %v1194_v44 = vpop.f32.mrf.mxu1  ;;  %v1235_v45 = vpop.f32.mrf.mxu0 }
 0x207   :  { %v1268_v47 = vmax.f32 %v1264_v40, 0.0  ;;  %v1270_v48 = vmax.f32 %v1266_v41, 0.0  ;;  %v1271_v51 = vpack.c.bf16 %v1267_v42, %v1267_v42  ;;  %v1273_v52 = vpack.c.bf16 %v1269_v43, %v1269_v43 }
 0x209   :  { %v1272_v49 = vpack.c.bf16 %v1268_v47, %v1268_v47  ;;  %v1274_v50 = vpack.c.bf16 %v1270_v48, %v1270_v48 }
 0x20b   :  { %1570 = vmatprep.mubr.bf16.mxu1 %v1272_v49  ;;  %1610 = vmatprep.mubr.bf16.mxu0 %v1274_v50 }
 0x20c   :  { %1571 = vmatmul.mubr.bf16.vlgmr.msra.gmra.mxu1 %v1271_v51  ;;  %1611 = vmatmul.mubr.bf16.vlgmr.msra.gmra.mxu0 %v1273_v52 }
 0x2cc   :  { %v1818_v53 = vpop.f32.mrf.mxu1  ;;  %v1840_v54 = vpop.f32.mrf.mxu0 }
 0x2ce   :  { %v1819_v56 = vpop.f32.mrf.mxu1  ;;  %v1841_v57 = vpop.f32.mrf.mxu0 }
 0x2cf   :  { %v1820_v58 = vadd.f32 %v1819_v56, %v1818_v53  ;;  %v1842_v39 = vadd.f32 %v1841_v57, %v1840_v54 }
 0x2d0   :  { %v1821_v59 = vpop.f32.mrf.mxu1  ;;  %v1843_v60 = vpop.f32.mrf.mxu0 }
 0x2d1   :  { %v1573_v61 = vadd.f32 %v1820_v58, %v1764_v55 }
 0x2d2   :  { %v1822_v62 = vpop.f32.mrf.mxu1  ;;  %v1844_v63 = vpop.f32.mrf.mxu0 }
 0x2d3   :  { %v1613_v0 = vadd.f32 %v1842_v39, %v1573_v61 }
 0x2d5   :  { %1618 = vst [vmem:[#allocation5] sm:$0x3] %v1613_v0 }
 0x2d6   :  { %2119 = shalt.err (!%p2116_p9)
}
 0x2d7   :  { %1628 = dma.vmem_to_hbm [thread:$0]  %s1626_s12, 32, %s2615_s7, [#allocation4]  }
 0x2d8   :  { %2130 = dma.done.wait [#allocation4], 32  }
 0x2d9   :  { %2131 = vsyncadd [#allocation4], 4294967264 }
 0x2da   :  { %1632 = vsyncpa [#allocation3], 1 }
 0x2db   :  { %1633 = vsyncpa [#allocation4], 1 }

</bundles_post_ra>
